<compile_context>
chip_gen: v7x
topology: tpu7x:2x2x1
jax: 0.10.0
libtpu: 0.0.40
codegen_flags: <defaults>
</compile_context>

<pallas_src>
import functools

import jax
import jax.numpy as jnp
from jax.experimental import pallas as pl
from jax.experimental.pallas import tpu as pltpu


_NEG_BIG = -1e30  # fill value for lane-padded class columns


def _latent_cls_head_kernel(x_ref, t_ref, w_ref, b_ref, out_ref, *, n_total, block_n):
    """One batch tile: fused predictor matmul + cross-entropy partial sum."""
    tile = pl.program_id(0)

    x = x_ref[...]            # (TN, C)  input features  (native dtype -> MXU)
    t = t_ref[...]            # (TN, C)  target features
    w = w_ref[...]            # (Kp, C)  predictor weight, native (num_classes, in_channels)
    b = b_ref[...]            # (1, Kp)  f32 bias, padded lanes = -1e30

    # Fused shared-RHS matmul: one (2*TN, C) @ (Kp, C)^T MXU pass, f32 accumulate.
    xt = jnp.concatenate([x, t], axis=0)                           # (2*TN, C)
    logits = jax.lax.dot_general(
        xt, w,
        dimension_numbers=(((1,), (1,)), ((), ())),                # contract on C
        preferred_element_type=jnp.float32,
    ) + b                                                          # (2*TN, Kp) f32

    pred = logits[:block_n]          # predictor(input)
    logits_t = logits[block_n:]      # predictor(target)   (no-grad path)

    tn, kp = pred.shape
    col = jax.lax.broadcasted_iota(jnp.int32, (tn, kp), 1)

    # label = argmax(logits_t, dim=1) with first-occurrence tie-break.
    max_t = jnp.max(logits_t, axis=1, keepdims=True)
    label = jnp.min(jnp.where(logits_t == max_t, col, kp), axis=1, keepdims=True)  # (TN,1)

    # cross entropy: logsumexp(pred) - pred[label]   (f32 elementwise path)
    pred_at_label = jnp.sum(jnp.where(col == label, pred, 0.0), axis=1, keepdims=True)
    row_max = jnp.max(pred, axis=1, keepdims=True)
    lse = row_max + jnp.log(jnp.sum(jnp.exp(pred - row_max), axis=1, keepdims=True))
    per_example = lse - pred_at_label                              # (TN, 1)

    # Mask rows past the true batch size (last ragged tile may read undefined pad rows).
    row = tile * block_n + jax.lax.broadcasted_iota(jnp.int32, (tn, 1), 0)
    per_example = jnp.where(row < n_total, per_example, 0.0)

    tile_sum = jnp.sum(per_example, axis=0, keepdims=True)         # (1, 1)
    out_ref[...] = tile_sum[None, :, :]                            # (1, 1, 1)


def latent_cls_head_forward(inp, target, weight, bias, *, block_n=256):
    """inp/target: (N, C); weight: (num_classes, in_channels); bias: (num_classes,).

    block_n: batch tile. Default 256 keeps the double-buffered working set well
    under v7x's 64 MiB VMEM for C ~ 4096 bf16; on v5e/v6e (128 MiB) 512-1024 is
    also fine.
    """
    n, c = inp.shape
    k = weight.shape[0]
    assert weight.shape == (k, c) and bias.shape == (k,)

    # Lane-pad num_classes to a multiple of 128. Padded weight rows are zero and
    # padded bias lanes are -1e30, so padded logits never affect max / argmax /
    # logsumexp.
    k_pad = ((k + 127) // 128) * 128
    w_p = jnp.pad(weight, ((0, k_pad - k), (0, 0)))
    b_p = jnp.concatenate(
        [bias.astype(jnp.float32),
         jnp.full((k_pad - k,), _NEG_BIG, dtype=jnp.float32)]
    ).reshape(1, k_pad)

    # Batch tile: multiple of 8 sublanes; ragged tails are masked in-kernel.
    tn = min(block_n, ((n + 7) // 8) * 8)
    num_tiles = pl.cdiv(n, tn)

    dsize = jnp.dtype(inp.dtype).itemsize
    cost = pl.CostEstimate(
        flops=2 * (2 * n) * c * k_pad,                       # one fused matmul
        transcendentals=n * (k_pad + 1),                     # exp + log
        bytes_accessed=2 * n * c * dsize + k_pad * c * jnp.dtype(weight.dtype).itemsize
        + 4 * k_pad + 4 * num_tiles,
    )

    partial = pl.pallas_call(
        functools.partial(_latent_cls_head_kernel, n_total=n, block_n=tn),
        out_shape=jax.ShapeDtypeStruct((num_tiles, 1, 1), jnp.float32),
        grid_spec=pltpu.PrefetchScalarGridSpec(
            num_scalar_prefetch=0,
            grid=(num_tiles,),
            in_specs=[
                pl.BlockSpec((tn, c), lambda i: (i, 0)),        # input tile
                pl.BlockSpec((tn, c), lambda i: (i, 0)),        # target tile
                pl.BlockSpec((k_pad, c), lambda i: (0, 0)),     # weight (resident)
                pl.BlockSpec((1, k_pad), lambda i: (0, 0)),     # bias   (resident)
            ],
            out_specs=pl.BlockSpec((1, 1, 1), lambda i: (i, 0, 0)),  # per-tile partial sum
        ),
        compiler_params=pltpu.CompilerParams(
            dimension_semantics=("parallel",),                  # lets v7x shard tiles over 2 TCs
            vmem_limit_bytes=48 * 1024 * 1024,                  # > 32 MiB default, < v7x 64 MiB
        ),
        cost_estimate=cost,
    )(inp, target, w_p, b_p)

    loss = jnp.sum(partial) / n                                 # mean over true batch size
    return {"loss": loss}


def _reference(inp, target, weight, bias):
    pred = inp @ weight.T + bias
    label = jnp.argmax(target @ weight.T + bias, axis=1)
    lse = jax.scipy.special.logsumexp(pred, axis=1)
    return jnp.mean(lse - pred[jnp.arange(pred.shape[0]), label])


if __name__ == "__main__":
    N, C, K = 8, 32, 16        # batch, in_channels, num_classes

    key = jax.random.PRNGKey(0)
    k_x, k_t, k_w = jax.random.split(key, 3)
    x = jax.random.normal(k_x, (N, C), dtype=jnp.float32)
    tgt = jax.random.normal(k_t, (N, C), dtype=jnp.float32)
    # normal_init(self.predictor, std=0.01): weight ~ N(0, 0.01), bias = 0
    w = 0.01 * jax.random.normal(k_w, (K, C), dtype=jnp.float32)
    b = jnp.zeros((K,), dtype=jnp.float32)

    out = latent_cls_head_forward(x, tgt, w, b)
    loss = jax.block_until_ready(out["loss"])

    ref = _reference(x, tgt, w, b)
    assert jnp.allclose(loss, ref, atol=1e-4, rtol=1e-4), (loss, ref)
    print("KERNEL_OK")
</pallas_src>

<mosaic_0001>
module attributes {stable_mosaic.version = 11 : i64} {
  func.func @_latent_cls_head_kernel(%arg0: i32, %arg1: memref<8x32xf32, #tpu.memory_space<vmem>>, %arg2: memref<8x32xf32, #tpu.memory_space<vmem>>, %arg3: memref<128x32xf32, #tpu.memory_space<vmem>>, %arg4: memref<1x128xf32, #tpu.memory_space<vmem>>, %arg5: memref<1x1x1xf32, #tpu.memory_space<vmem>>) attributes {dimension_semantics = [#tpu.dimension_semantics<parallel>], iteration_bounds = array<i64: 1>, scalar_prefetch = 0 : i64, scratch_operands = 0 : i64, tpu.core_type = #tpu.core_type<tc>, window_params = [{transform_indices = @transform_0, window_bounds = array<i64: 8, 32>}, {transform_indices = @transform_1, window_bounds = array<i64: 8, 32>}, {pipeline_mode = #tpu.pipeline_mode<synchronous>, transform_indices = @transform_2, window_bounds = array<i64: 128, 32>}, {pipeline_mode = #tpu.pipeline_mode<synchronous>, transform_indices = @transform_3, window_bounds = array<i64: 1, 128>}, {transform_indices = @transform_4, window_bounds = array<i64: 1, 1, 1>}]} {
    %c0 = arith.constant 0 : index
    %c0_0 = arith.constant 0 : index
    %0 = vector.load %arg1[%c0, %c0_0] : memref<8x32xf32, #tpu.memory_space<vmem>>, vector<8x32xf32>
    %c0_1 = arith.constant 0 : index
    %c0_2 = arith.constant 0 : index
    %1 = vector.load %arg2[%c0_1, %c0_2] : memref<8x32xf32, #tpu.memory_space<vmem>>, vector<8x32xf32>
    %c0_3 = arith.constant 0 : index
    %c0_4 = arith.constant 0 : index
    %2 = vector.load %arg3[%c0_3, %c0_4] : memref<128x32xf32, #tpu.memory_space<vmem>>, vector<128x32xf32>
    %c0_5 = arith.constant 0 : index
    %c0_6 = arith.constant 0 : index
    %3 = vector.load %arg4[%c0_5, %c0_6] : memref<1x128xf32, #tpu.memory_space<vmem>>, vector<1x128xf32>
    %4 = tpu.concatenate %0, %1 in 0 : vector<8x32xf32>, vector<8x32xf32> -> vector<16x32xf32>
    %cst = arith.constant dense<0.000000e+00> : vector<16x128xf32>
    %5 = tpu.matmul %4, %2, %cst {dimension_numbers = #tpu.dot_dimension_numbers<[1], [1], [0], [0], [0, 0, 1, 0], [], []>} : vector<16x32xf32>, vector<128x32xf32>, vector<16x128xf32> -> vector<16x128xf32>
    %6 = vector.broadcast %3 : vector<1x128xf32> to vector<16x128xf32>
    %7 = arith.addf %5, %6 : vector<16x128xf32>
    %8 = vector.extract_strided_slice %7 {offsets = [0, 0], sizes = [8, 128], strides = [1, 1]} : vector<16x128xf32> to vector<8x128xf32>
    %9 = vector.extract_strided_slice %7 {offsets = [8, 0], sizes = [8, 128], strides = [1, 1]} : vector<16x128xf32> to vector<8x128xf32>
    %10 = tpu.iota {dimensions = array<i32: 1>} : vector<8x128xi32>
    %cst_7 = arith.constant dense<0xFF800000> : vector<8xf32>
    %11 = vector.multi_reduction <maximumf>, %9, %cst_7 [1] : vector<8x128xf32> to vector<8xf32>
    %12 = vector.shape_cast %11 : vector<8xf32> to vector<8x1xf32>
    %13 = vector.broadcast %12 : vector<8x1xf32> to vector<8x128xf32>
    %14 = arith.cmpf oeq, %9, %13 : vector<8x128xf32>
    %c128_i32 = arith.constant 128 : i32
    %15 = vector.broadcast %c128_i32 : i32 to vector<8x128xi32>
    %16 = arith.select %14, %10, %15 : vector<8x128xi1>, vector<8x128xi32>
    %cst_8 = arith.constant dense<2147483647> : vector<8xi32>
    %17 = vector.multi_reduction <minsi>, %16, %cst_8 [1] : vector<8x128xi32> to vector<8xi32>
    %18 = vector.shape_cast %17 : vector<8xi32> to vector<8x1xi32>
    %19 = vector.broadcast %18 : vector<8x1xi32> to vector<8x128xi32>
    %20 = arith.cmpi eq, %10, %19 : vector<8x128xi32>
    %cst_9 = arith.constant 0.000000e+00 : f32
    %21 = vector.broadcast %cst_9 : f32 to vector<8x128xf32>
    %22 = arith.select %20, %8, %21 : vector<8x128xi1>, vector<8x128xf32>
    %cst_10 = arith.constant dense<0.000000e+00> : vector<8xf32>
    %23 = vector.multi_reduction <add>, %22, %cst_10 [1] : vector<8x128xf32> to vector<8xf32>
    %24 = vector.shape_cast %23 : vector<8xf32> to vector<8x1xf32>
    %cst_11 = arith.constant dense<0xFF800000> : vector<8xf32>
    %25 = vector.multi_reduction <maximumf>, %8, %cst_11 [1] : vector<8x128xf32> to vector<8xf32>
    %26 = vector.shape_cast %25 : vector<8xf32> to vector<8x1xf32>
    %27 = vector.broadcast %26 : vector<8x1xf32> to vector<8x128xf32>
    %28 = arith.subf %8, %27 : vector<8x128xf32>
    %29 = math.exp %28 : vector<8x128xf32>
    %cst_12 = arith.constant dense<0.000000e+00> : vector<8xf32>
    %30 = vector.multi_reduction <add>, %29, %cst_12 [1] : vector<8x128xf32> to vector<8xf32>
    %31 = vector.shape_cast %30 : vector<8xf32> to vector<8x1xf32>
    %32 = math.log %31 : vector<8x1xf32>
    %33 = arith.addf %26, %32 : vector<8x1xf32>
    %34 = arith.subf %33, %24 : vector<8x1xf32>
    %c8_i32 = arith.constant 8 : i32
    %35 = arith.muli %arg0, %c8_i32 : i32
    %36 = tpu.iota {dimensions = array<i32: 0>} : vector<8x1xi32>
    %37 = vector.broadcast %35 : i32 to vector<8x1xi32>
    %38 = arith.addi %37, %36 : vector<8x1xi32>
    %c8_i32_13 = arith.constant 8 : i32
    %39 = vector.broadcast %c8_i32_13 : i32 to vector<8x1xi32>
    %40 = arith.cmpi slt, %38, %39 : vector<8x1xi32>
    %cst_14 = arith.constant 0.000000e+00 : f32
    %41 = vector.broadcast %cst_14 : f32 to vector<8x1xf32>
    %42 = arith.select %40, %34, %41 : vector<8x1xi1>, vector<8x1xf32>
    %cst_15 = arith.constant dense<0.000000e+00> : vector<1xf32>
    %43 = vector.multi_reduction <add>, %42, %cst_15 [0] : vector<8x1xf32> to vector<1xf32>
    %44 = vector.shape_cast %43 : vector<1xf32> to vector<1x1xf32>
    %45 = vector.shape_cast %44 : vector<1x1xf32> to vector<1x1x1xf32>
    %c0_16 = arith.constant 0 : index
    %c0_17 = arith.constant 0 : index
    %c0_18 = arith.constant 0 : index
    %46 = vector.load %arg5[%c0_16, %c0_17, %c0_18] : memref<1x1x1xf32, #tpu.memory_space<vmem>>, vector<1x1x1xf32>
    tpu.vector_store %arg5[%c0_16, %c0_17, %c0_18], %45 {strides = array<i32>} : memref<1x1x1xf32, #tpu.memory_space<vmem>>, vector<1x1x1xf32>,
    return
  }
  func.func @transform_0(%arg0: i32) -> (i32, i32) {
    %c0_i32 = arith.constant 0 : i32
    %c0_i32_0 = arith.constant 0 : i32
    return %arg0, %c0_i32 : i32, i32
  }
  func.func @transform_1(%arg0: i32) -> (i32, i32) {
    %c0_i32 = arith.constant 0 : i32
    %c0_i32_0 = arith.constant 0 : i32
    return %arg0, %c0_i32 : i32, i32
  }
  func.func @transform_2(%arg0: i32) -> (i32, i32) {
    %c0_i32 = arith.constant 0 : i32
    %c0_i32_0 = arith.constant 0 : i32
    %c0_i32_1 = arith.constant 0 : i32
    return %c0_i32, %c0_i32_0 : i32, i32
  }
  func.func @transform_3(%arg0: i32) -> (i32, i32) {
    %c0_i32 = arith.constant 0 : i32
    %c0_i32_0 = arith.constant 0 : i32
    %c0_i32_1 = arith.constant 0 : i32
    return %c0_i32, %c0_i32_0 : i32, i32
  }
  func.func @transform_4(%arg0: i32) -> (i32, i32, i32) {
    %c0_i32 = arith.constant 0 : i32
    %c0_i32_0 = arith.constant 0 : i32
    %c0_i32_1 = arith.constant 0 : i32
    return %arg0, %c0_i32, %c0_i32_0 : i32, i32, i32
  }
}

</mosaic_0001>

<bundles_post_ra>
// kernel: tpu_custom_call.1
= control target key start
LH: loop header
LB: loop body
LE: loop exit
PB: predicated region body
PF: predicated region fallthrough
CT: control target
= control target key end

     0   :  { %vm43_vm0 = vcmask 261120   ;;  %s521_s0 = inlined_call_operand.vmem [shape: f32[8,32], index: 0, kind: input, shape index: {}]   ;;  %s522_s1 = inlined_call_operand.vmem [shape: f32[8,32], index: 1, kind: input, shape index: {}]   ;;  %s523_s2 = inlined_call_operand.vmem [shape: f32[128,32], index: 2, kind: input, shape index: {}]   ;;  %s524_s3 = inlined_call_operand.vmem [shape: f32[1,128], index: 3, kind: input, shape index: {}]   ;;  %s525_s4 = inlined_call_operand.hbm [shape: f32[1,1,1], index: 4, kind: output, shape index: {}]  }
   0x1   :  { %v20_v0 = vld [vmem:[%s523_s2] sm:$0xff]  ;;  %v21_v1 = vld [vmem:[%s523_s2 + $0x8] sm:$0xff]  ;;  %v22_v2 = vld [vmem:[%s523_s2 + $0x10] sm:$0xff] }
   0x2   :  { %v309_v3 = vpack.c.bf16 %v21_v1, %v20_v0  ;;  %vm423_vm1 = vmpackc.low %vm43_vm0, %vm43_vm0  ;;  %v23_v5 = vld [vmem:[%s523_s2 + $0x18] sm:$0xff]  ;;  %v18_v7 = vld [vmem:[%s521_s0] sm:$0xff] }
   0x3   :  { %v315_v6 = vpack.c.bf16 %v23_v5, %v22_v2  ;;  %v24_v8 = vld [vmem:[%s523_s2 + $0x20] sm:$0xff]  ;;  %v25_v9 = vld [vmem:[%s523_s2 + $0x28] sm:$0xff]  ;;  %306 = vmatprep.mubr.msk.f32.mxu0 %vm43_vm0, %v18_v7 }
   0x4   :  { %311 = vmatprep.subr.msk.bf16.mxu0 %vm423_vm1, %v309_v3 }
   0x5   :  { %314 = vmatpush3.bf16.xpose.msk.msra.mxu0 %vm423_vm1, %v309_v3 }
   0x6   :  { %317 = vmatprep.subr.msk.bf16.mxu0 %vm423_vm1, %v315_v6 }
   0x7   :  { %9 = vsyncpa [#allocation3], 0  ;;  %v321_v10 = vpack.c.bf16 %v25_v9, %v24_v8  ;;  %v26_v11 = vld [vmem:[%s523_s2 + $0x30] sm:$0xff]  ;;  %v27_v12 = vld [vmem:[%s523_s2 + $0x38] sm:$0xff]  ;;  %v173_v32 = vlaneseq  ;;  %vm221_vm5 = vcmask 0  }
   0x8   :  { %v327_v13 = vpack.c.bf16 %v27_v12, %v26_v11  ;;  %v28_v14 = vld [vmem:[%s523_s2 + $0x40] sm:$0xff]  ;;  %v29_v15 = vld [vmem:[%s523_s2 + $0x48] sm:$0xff]  ;;  %v30_v17 = vld [vmem:[%s523_s2 + $0x50] sm:$0xff] }
   0x9   :  { %v333_v16 = vpack.c.bf16 %v29_v15, %v28_v14  ;;  %v31_v18 = vld [vmem:[%s523_s2 + $0x58] sm:$0xff]  ;;  %v32_v20 = vld [vmem:[%s523_s2 + $0x60] sm:$0xff]  ;;  %v33_v21 = vld [vmem:[%s523_s2 + $0x68] sm:$0xff]  ;;  %v174_v33 = vand.u32 127, %v173_v32 }
   0xa   :  { %v339_v19 = vpack.c.bf16 %v31_v18, %v30_v17  ;;  %v345_v22 = vpack.c.bf16 %v33_v21, %v32_v20  ;;  %v34_v23 = vld [vmem:[%s523_s2 + $0x70] sm:$0xff]  ;;  %v35_v24 = vld [vmem:[%s523_s2 + $0x78] sm:$0xff]  ;;  %v19_v26 = vld [vmem:[%s522_s1] sm:$0xff]  ;;  %s386_s1 = smov [#allocation2]  }
   0xb   :  { %v351_v25 = vpack.c.bf16 %v35_v24, %v34_v23  ;;  %v237_v27 = vld [vmem:[%s524_s3] ss:$0 sm:$0xff]  ;;  %s229_s2 = sshll.u32 %s386_s1, 4  ;;  %s230_s2 = int_to_ptr.vmem [resolvable:$true] %s229_s2 }
   0xc   :  { %s362_s3 = scalar_lea.vmem %s230_s2, 16  ;;  %s366_s26 = scalar_lea.vmem %s230_s2, 32 }
   0xd   :  { %320 = vmatpush3.bf16.xpose.msk.msra.mxu0 %vm423_vm1, %v315_v6  ;;  %p363_p0 = scmp.ne.s32.totalorder %s230_s2, %s362_s3  ;;  %p367_p1 = scmp.lt.s32.totalorder %s230_s2, %s230_s2 }
   0xe   :  { %323 = vmatprep.subr.msk.bf16.mxu0 %vm423_vm1, %v321_v10  ;;  %p368_p2 = scmp.lt.s32.totalorder %s366_s26, %s362_s3 }
  0x10   :  { %p369_p3 = por %p368_p2, %p367_p1 }
  0x12   :  { %p370_p4 = pnand %p369_p3, %p363_p0 }
  0x15   :  { %326 = vmatpush3.bf16.xpose.msk.msra.mxu0 %vm423_vm1, %v321_v10 }
  0x16   :  { %329 = vmatprep.subr.msk.bf16.mxu0 %vm423_vm1, %v327_v13 }
  0x1d   :  { %332 = vmatpush3.bf16.xpose.msk.msra.mxu0 %vm423_vm1, %v327_v13 }
  0x1e   :  { %335 = vmatprep.subr.msk.bf16.mxu0 %vm423_vm1, %v333_v16 }
  0x25   :  { %338 = vmatpush3.bf16.xpose.msk.msra.mxu0 %vm423_vm1, %v333_v16 }
  0x26   :  { %341 = vmatprep.subr.msk.bf16.mxu0 %vm423_vm1, %v339_v19 }
  0x2d   :  { %344 = vmatpush3.bf16.xpose.msk.msra.mxu0 %vm423_vm1, %v339_v19 }
  0x2e   :  { %347 = vmatprep.subr.msk.bf16.mxu0 %vm423_vm1, %v345_v22 }
  0x35   :  { %350 = vmatpush3.bf16.xpose.msk.msra.mxu0 %vm423_vm1, %v345_v22 }
  0x36   :  { %353 = vmatprep.subr.msk.bf16.mxu0 %vm423_vm1, %v351_v25 }
  0x3d   :  { %356 = vmatpush3.bf16.xpose.msk.msra.mxu0 %vm423_vm1, %v351_v25 }
  0x44   :  { %307 = vmatmul.mubr.msk.f32.vlgmr.msra.gmra.mrb[0].mxu0 %vm43_vm0, %v19_v26 }
 0x117   :  { %v308_v28 = vpop.f32.mrb[0].mxu0 }
 0x118   :  { %v170_v29 = vadd.f32 %v308_v28, %v237_v27  ;;  %v164_v30 = vpop.f32.mrb[1].mxu0 }
 0x119   :  { %v165_v31 = vadd.f32 %v237_v27, %v164_v30 }
 0x11a   :  { %175 = vmax.xlane.f32.xlu0 %v170_v29 }
 0x11b   :  { %197 = vmax.xlane.f32.xlu1 %v165_v31 }
 0x1a7   :  { %v176_v34 = vpop.xlane.xlu0 %175 }
 0x1a8   :  { %vm177_vm2 = vcmp.eq.f32.partialorder %v170_v29, %v176_v34  ;;  %v198_v35 = vpop.xlane.xlu1 %197 }
 0x1a9   :  { %v178_v36 = vsel %vm177_vm2, %v174_v33, 128  ;;  %v199_v37 = vsub.f32 %v165_v31, %v198_v35 }
 0x1aa   :  { %v180_v38 = vshra.s32 %v178_v36, 16  ;;  %v179_v42 = vand.u32 65535, %v178_v36 }
 0x1ab   :  { %v200_v39 = vmul.f32 1.442695, %v199_v37 }
 0x1ac   :  { %v182_v40 = vcvt.s32.f32 %v180_v38  ;;  %v181_v44 = vcvt.s32.f32 %v179_v42 }
 0x1ad   :  { %358 = vpow2.f32 %v200_v39 }
 0x1ae   :  { %183 = vmin.xlane.f32.xlu0 %v182_v40 }
 0x1b7   :  { %v359_v41 = vpop.eup %358 }
 0x1b8   :  { %202 = vadd.xlane.f32.xlu0 %v359_v41 }
 0x23b   :  { %v184_v43 = vpop.xlane.xlu0 %183 }
 0x23c   :  { %vm185_vm3 = vcmp.eq.f32.partialorder %v182_v40, %v184_v43  ;;  %v190_v46 = vcvt.f32.s32 %v184_v43 }
 0x23d   :  { %v186_v45 = vsel %vm185_vm3, %v181_v44, inf }
 0x23e   :  { %187 = vmin.xlane.f32.xlu1 %v186_v45  ;;  %v191_v48 = vshll.u32 %v190_v46, 16 }
 0x245   :  { %v203_v52 = vpop.xlane.xlu0 %202 }
 0x246   :  { %360 = vlog2.f32 %v203_v52 }
 0x250   :  { %v361_v53 = vpop.eup %360 }
 0x251   :  { %v205_v54 = vmul.f32 0.6931472, %v361_v53 }
 0x253   :  { %v206_v55 = vadd.f32 %v205_v54, %v198_v35 }
 0x2cb   :  { %v188_v47 = vpop.xlane.xlu1 %187 }
 0x2cc   :  { %v189_v49 = vcvt.f32.s32 %v188_v47 }
 0x2ce   :  { %v192_v50 = vadd.s32 %v191_v48, %v189_v49 }
 0x2d0   :  { %vm193_vm4 = vcmp.eq.s32.totalorder %v174_v33, %v192_v50 }
 0x2d1   :  { %v194_v51 = vsel %vm193_vm4, %v165_v31, 0.0 }
 0x2d2   :  { %195 = vadd.xlane.f32.xlu1 %v194_v51 }
 0x35f   :  { %v196_v56 = vpop.xlane.xlu1 %195 }
 0x360   :  { %v207_v57 = vsub.f32 %v206_v55, %v196_v56 }
 0x362   :  { %v215_v58 = vrot.slane %v207_v57, 4 }
 0x364   :  { %v216_v59 = vadd.f32 %v215_v58, %v207_v57 }
 0x366   :  { %v217_v60 = vrot.slane %v216_v59, 2 }
 0x368   :  { %v218_v61 = vadd.f32 %v217_v60, %v216_v59 }
 0x36a   :  { %v219_v62 = vrot.slane %v218_v61, 1 }
 0x36c   :  { %v220_v63 = vadd.f32 %v219_v62, %v218_v61 }
 0x36e   :  { %222 = vst.msk [vmem:[#allocation2] sm:$0x1] %vm221_vm5, %v220_v63 }
 0x36f   :  { %373 = shalt.err (!%p370_p4)
}
 0x370   :  { %s374_s29 = scalar_lea.hbm %s525_s4, 16 }
 0x371   :  { %p375_p5 = scmp.ne.s32.totalorder %s525_s4, %s374_s29  ;;  %p378_p6 = scmp.lt.u32.totalorder %s374_s29, %s525_s4 }
 0x373   :  { %p380_p7 = pnand %p378_p6, %p375_p5 }
 0x375   :  { %383 = shalt.err (!%p380_p7)
}
 0x376   :  { %232 = dma.vmem_to_hbm [thread:$0]  %s230_s2, 16, %s525_s4, [#allocation3]  }
 0x377   :  { %384 = dma.done.wait [#allocation3], 16  }
 0x378   :  { %385 = vsyncadd [#allocation3], 4294967280 }
 0x379   :  { %236 = vsyncpa [#allocation3], 1 }

</bundles_post_ra>
